<compile_context>
chip_gen: v6e
topology: v6e:2x2x1
jax: 0.10.0
libtpu: 0.0.40
codegen_flags: <defaults>
</compile_context>

<pallas_src>
import math

import jax
import jax.numpy as jnp
from jax.experimental import pallas as pl
from jax.experimental.pallas import tpu as pltpu


def _width_embed_kernel(idx_ref, table_ref, out_ref):
    """One tile of the packed embedding gather.

    idx_ref:   (M, P)      int32  -- P consecutive flat indices per output row
    table_ref: (P*L, P*D)  f32    -- block-diagonal replica of the table
    out_ref:   (M, P*D)    f32    -- P embeddings concatenated per row (128 lanes)
    """
    ids = idx_ref[...]                               # (M, P) int32
    m, p = ids.shape
    kdim = table_ref.shape[0]                        # P * L
    # one_hot[q, l*P + j] = (ids[q, j] == l), built with P independent
    # lane-broadcast compares (VPU); OOB / negative ids never match -> zero row.
    col = jax.lax.broadcasted_iota(jnp.int32, (m, kdim), 1)
    oh = jnp.zeros((m, kdim), jnp.float32)
    for j in range(p):
        key_j = ids[:, j:j + 1] * p + j              # (M, 1)
        oh = oh + (col == key_j).astype(jnp.float32)
    # gather == one_hot @ block-diag(table): MXU, f32 accumulation, exact.
    out_ref[...] = jnp.dot(
        oh, table_ref[...], preferred_element_type=jnp.float32
    ).astype(out_ref.dtype)


def _round_up(x, m):
    return ((x + m - 1) // m) * m


def width_forward(widths, table, *, tile_n=None):
    """Pallas equivalent of Width.forward(widths).

    widths: integer array of arbitrary shape.
    table:  (L, D) float32 embedding table.
    returns: widths.shape + (D,) float32.
    Note: out-of-range / negative indices produce a zero embedding row.
    """
    L, D = table.shape
    orig_shape = widths.shape
    n = math.prod(orig_shape) if len(orig_shape) > 0 else 1
    if n == 0:
        return jnp.zeros((*orig_shape, D), table.dtype)

    # Pack P indices per output row so the output tile is 128-lane dense.
    pack = 128 // D if (D <= 128 and 128 % D == 0) else 1
    row_unit = 8 * pack                       # keep the sublane dim a multiple of 8

    if tile_n is None:
        # ~1 MiB output tile: good HBM pipelining, VMEM-safe on every generation.
        tile_n = max(row_unit, ((1 << 20) // (D * 4)) // row_unit * row_unit)
    tile_n = _round_up(tile_n, row_unit)
    tile_n = min(tile_n, _round_up(n, row_unit))

    n_pad = _round_up(n, tile_n)
    flat = widths.reshape(-1).astype(jnp.int32)
    flat = jnp.pad(flat, (0, n_pad - n))      # pad with index 0; sliced off below
    idx2 = flat.reshape(n_pad // pack, pack)

    # Block-diagonal replica: row l*P+j, cols j*D:(j+1)*D hold table[l]  (tiny,
    # e.g. 32 KiB for L=16, D=32, P=4; built once by XLA outside the kernel).
    eye_p = jnp.eye(pack, dtype=table.dtype)
    table_big = jnp.einsum("ld,jk->ljkd", table, eye_p).reshape(pack * L, pack * D)

    m_tile = tile_n // pack
    grid = (n_pad // tile_n,)

    out_packed = pl.pallas_call(
        _width_embed_kernel,
        grid=grid,
        in_specs=[
            pl.BlockSpec((m_tile, pack), lambda i: (i, 0)),            # indices tile
            pl.BlockSpec((pack * L, pack * D), lambda i: (0, 0)),      # table (resident)
        ],
        out_specs=pl.BlockSpec((m_tile, pack * D), lambda i: (i, 0)),  # lane-dense out
        out_shape=jax.ShapeDtypeStruct((n_pad // pack, pack * D), table.dtype),
        compiler_params=pltpu.CompilerParams(
            dimension_semantics=("parallel",),   # independent tiles -> megacore on v7x
        ),
    )(idx2, table_big)

    # (N_pad/P, P*D) row-major is byte-identical to (N_pad, D): free reshape.
    out = out_packed.reshape(n_pad, D)[:n]
    return out.reshape(*orig_shape, D)


if __name__ == "__main__":
    # Deterministic parameters (mirrors nn.Embedding(L, width_dim)).
    L = 16          # number of distinct span widths
    width_dim = 32  # args.width_dim

    key = jax.random.PRNGKey(0)
    k_table, k_idx, k_idx2 = jax.random.split(key, 3)
    table = jax.random.normal(k_table, (L, width_dim), dtype=jnp.float32)

    # Small example: batch of span-width indices, shape (2, 8).
    widths = jax.random.randint(k_idx, (2, 8), 0, L, dtype=jnp.int32)
    out = jax.block_until_ready(width_forward(widths, table))
    ref = jnp.take(table, widths, axis=0)
    assert out.shape == (2, 8, width_dim), out.shape
    assert jnp.allclose(out, ref, atol=1e-6), "mismatch vs reference gather"

    # Multi-tile + ragged-tail path (small tile forces several grid steps).
    widths2 = jax.random.randint(k_idx2, (3, 70), 0, L, dtype=jnp.int32)
    out2 = jax.block_until_ready(width_forward(widths2, table, tile_n=64))
    ref2 = jnp.take(table, widths2, axis=0)
    assert out2.shape == (3, 70, width_dim), out2.shape
    assert jnp.allclose(out2, ref2, atol=1e-6), "mismatch vs reference (tiled path)"

    print("KERNEL_OK")
</pallas_src>

<mosaic_0001>
module attributes {stable_mosaic.version = 11 : i64} {
  func.func @_width_embed_kernel(%arg0: i32, %arg1: memref<8x4xi32, #tpu.memory_space<vmem>>, %arg2: memref<64x128xf32, #tpu.memory_space<vmem>>, %arg3: memref<8x128xf32, #tpu.memory_space<vmem>>) attributes {dimension_semantics = [#tpu.dimension_semantics<parallel>], iteration_bounds = array<i64: 1>, scalar_prefetch = 0 : i64, scratch_operands = 0 : i64, tpu.core_type = #tpu.core_type<tc>, window_params = [{transform_indices = @transform_0, window_bounds = array<i64: 8, 4>}, {pipeline_mode = #tpu.pipeline_mode<synchronous>, transform_indices = @transform_1, window_bounds = array<i64: 64, 128>}, {transform_indices = @transform_2, window_bounds = array<i64: 8, 128>}]} {
    %c0 = arith.constant 0 : index
    %c0_0 = arith.constant 0 : index
    %0 = vector.load %arg1[%c0, %c0_0] : memref<8x4xi32, #tpu.memory_space<vmem>>, vector<8x4xi32>
    %1 = tpu.iota {dimensions = array<i32: 1>} : vector<8x64xi32>
    %cst = arith.constant 0.000000e+00 : f32
    %2 = vector.broadcast %cst : f32 to vector<8x64xf32>
    %3 = vector.extract_strided_slice %0 {offsets = [0, 0], sizes = [8, 1], strides = [1, 1]} : vector<8x4xi32> to vector<8x1xi32>
    %c4_i32 = arith.constant 4 : i32
    %4 = vector.broadcast %c4_i32 : i32 to vector<8x1xi32>
    %5 = arith.muli %3, %4 : vector<8x1xi32>
    %c0_i32 = arith.constant 0 : i32
    %6 = vector.broadcast %c0_i32 : i32 to vector<8x1xi32>
    %7 = arith.addi %5, %6 : vector<8x1xi32>
    %8 = vector.broadcast %7 : vector<8x1xi32> to vector<8x64xi32>
    %9 = arith.cmpi eq, %1, %8 : vector<8x64xi32>
    %10 = arith.extui %9 : vector<8x64xi1> to vector<8x64xi32>
    %11 = arith.sitofp %10 : vector<8x64xi32> to vector<8x64xf32>
    %12 = arith.addf %2, %11 : vector<8x64xf32>
    %13 = vector.extract_strided_slice %0 {offsets = [0, 1], sizes = [8, 1], strides = [1, 1]} : vector<8x4xi32> to vector<8x1xi32>
    %c4_i32_1 = arith.constant 4 : i32
    %14 = vector.broadcast %c4_i32_1 : i32 to vector<8x1xi32>
    %15 = arith.muli %13, %14 : vector<8x1xi32>
    %c1_i32 = arith.constant 1 : i32
    %16 = vector.broadcast %c1_i32 : i32 to vector<8x1xi32>
    %17 = arith.addi %15, %16 : vector<8x1xi32>
    %18 = vector.broadcast %17 : vector<8x1xi32> to vector<8x64xi32>
    %19 = arith.cmpi eq, %1, %18 : vector<8x64xi32>
    %20 = arith.extui %19 : vector<8x64xi1> to vector<8x64xi32>
    %21 = arith.sitofp %20 : vector<8x64xi32> to vector<8x64xf32>
    %22 = arith.addf %12, %21 : vector<8x64xf32>
    %23 = vector.extract_strided_slice %0 {offsets = [0, 2], sizes = [8, 1], strides = [1, 1]} : vector<8x4xi32> to vector<8x1xi32>
    %c4_i32_2 = arith.constant 4 : i32
    %24 = vector.broadcast %c4_i32_2 : i32 to vector<8x1xi32>
    %25 = arith.muli %23, %24 : vector<8x1xi32>
    %c2_i32 = arith.constant 2 : i32
    %26 = vector.broadcast %c2_i32 : i32 to vector<8x1xi32>
    %27 = arith.addi %25, %26 : vector<8x1xi32>
    %28 = vector.broadcast %27 : vector<8x1xi32> to vector<8x64xi32>
    %29 = arith.cmpi eq, %1, %28 : vector<8x64xi32>
    %30 = arith.extui %29 : vector<8x64xi1> to vector<8x64xi32>
    %31 = arith.sitofp %30 : vector<8x64xi32> to vector<8x64xf32>
    %32 = arith.addf %22, %31 : vector<8x64xf32>
    %33 = vector.extract_strided_slice %0 {offsets = [0, 3], sizes = [8, 1], strides = [1, 1]} : vector<8x4xi32> to vector<8x1xi32>
    %c4_i32_3 = arith.constant 4 : i32
    %34 = vector.broadcast %c4_i32_3 : i32 to vector<8x1xi32>
    %35 = arith.muli %33, %34 : vector<8x1xi32>
    %c3_i32 = arith.constant 3 : i32
    %36 = vector.broadcast %c3_i32 : i32 to vector<8x1xi32>
    %37 = arith.addi %35, %36 : vector<8x1xi32>
    %38 = vector.broadcast %37 : vector<8x1xi32> to vector<8x64xi32>
    %39 = arith.cmpi eq, %1, %38 : vector<8x64xi32>
    %40 = arith.extui %39 : vector<8x64xi1> to vector<8x64xi32>
    %41 = arith.sitofp %40 : vector<8x64xi32> to vector<8x64xf32>
    %42 = arith.addf %32, %41 : vector<8x64xf32>
    %c0_4 = arith.constant 0 : index
    %c0_5 = arith.constant 0 : index
    %43 = vector.load %arg2[%c0_4, %c0_5] : memref<64x128xf32, #tpu.memory_space<vmem>>, vector<64x128xf32>
    %cst_6 = arith.constant dense<0.000000e+00> : vector<8x128xf32>
    %44 = tpu.matmul %42, %43, %cst_6 {dimension_numbers = #tpu.dot_dimension_numbers<[1], [0], [0], [1], [0, 0, 1, 1], [], []>} : vector<8x64xf32>, vector<64x128xf32>, vector<8x128xf32> -> vector<8x128xf32>
    %c0_7 = arith.constant 0 : index
    %c0_8 = arith.constant 0 : index
    %45 = vector.load %arg3[%c0_7, %c0_8] : memref<8x128xf32, #tpu.memory_space<vmem>>, vector<8x128xf32>
    tpu.vector_store %arg3[%c0_7, %c0_8], %44 {strides = array<i32>} : memref<8x128xf32, #tpu.memory_space<vmem>>, vector<8x128xf32>,
    return
  }
  func.func @transform_0(%arg0: i32) -> (i32, i32) {
    %c0_i32 = arith.constant 0 : i32
    %c0_i32_0 = arith.constant 0 : i32
    return %arg0, %c0_i32 : i32, i32
  }
  func.func @transform_1(%arg0: i32) -> (i32, i32) {
    %c0_i32 = arith.constant 0 : i32
    %c0_i32_0 = arith.constant 0 : i32
    %c0_i32_1 = arith.constant 0 : i32
    return %c0_i32, %c0_i32_0 : i32, i32
  }
  func.func @transform_2(%arg0: i32) -> (i32, i32) {
    %c0_i32 = arith.constant 0 : i32
    %c0_i32_0 = arith.constant 0 : i32
    return %arg0, %c0_i32 : i32, i32
  }
}

</mosaic_0001>

<bundles_post_ra>
// kernel: tpu_custom_call.1
= control target key start
LH: loop header
LB: loop body
LE: loop exit
PB: predicated region body
PF: predicated region fallthrough
CT: control target
= control target key end

     0   :  { %7 = vsyncpa [#allocation3], 0  ;;  %s285_s0 = inlined_call_operand.vmem [shape: s32[8,4], index: 0, kind: input, shape index: {}]   ;;  %s286_s1 = inlined_call_operand.hbm [shape: f32[64,128], index: 1, kind: input, shape index: {}]   ;;  %s287_s2 = inlined_call_operand.hbm [shape: f32[8,128], index: 2, kind: output, shape index: {}]  }
   0x1   :  { %8 = vsyncpa [#allocation4], 0  ;;  %s251_s9 = smov [#allocation2]  }
   0x2   :  { %s16_s10 = sshll.u32 %s251_s9, 4  ;;  %s17_s10 = int_to_ptr.vmem [resolvable:$true] %s16_s10 }
   0x3   :  { %s215_s11 = scalar_lea.vmem %s17_s10, 1024  ;;  %p220_p1 = scmp.lt.s32.totalorder %s17_s10, %s17_s10 }
   0x4   :  { %p216_p0 = scmp.ne.s32.totalorder %s17_s10, %s215_s11  ;;  %p221_p2 = scmp.lt.s32.totalorder %s215_s11, %s215_s11 }
   0x6   :  { %p222_p3 = por %p221_p2, %p220_p1 }
   0x8   :  { %p223_p4 = pnand %p222_p3, %p216_p0 }
   0xa   :  { %226 = shalt.err (!%p223_p4)
}
   0xb   :  { %s252_s12 = smov 128   ;;  %s253_s13 = smov 8  }
   0xc   :  { %22 = dma.hbm_to_vmem [thread:$0]  %s286_s1, 1024, %s17_s10, [#allocation3], %s252_s12, %s252_s12, %s253_s13  }
   0xd   :  { %247 = dma.done.wait [#allocation3], 1024  }
   0xe   :  { %248 = vsyncadd [#allocation3], 4294966272  ;;  %v254_v0 = vmov 0   ;;  %v255_v1 = vmov 2   ;;  %v256_v2 = vmov 0.0   ;;  %v26_v3 = vld [vmem:[%s285_s0] sm:$0xff]  ;;  %v27_v18 = vlaneseq }
   0xf   :  { %202 = vset.pattern.permute.xlu0 %v254_v0  ;;  %204 = vset.pattern.permute.xlu1 %v255_v1  ;;  %v68_v4 = vld [vmem:[#allocation2 + $0x38] sm:$0xff]  ;;  %v67_v5 = vld [vmem:[#allocation2 + $0x30] sm:$0xff]  ;;  %v29_v6 = vmul.u32 4, %v26_v3  ;;  %v66_v7 = vld [vmem:[#allocation2 + $0x28] sm:$0xff]  ;;  %v257_v13 = vmov 1   ;;  %v258_v15 = vmov 3  }
  0x10   :  { %173 = vmatprep.subr.mxu0 %v256_v2  ;;  %v65_v10 = vld [vmem:[#allocation2 + $0x20] sm:$0xff]  ;;  %v64_v12 = vld [vmem:[#allocation2 + $0x18] sm:$0xff]  ;;  %v63_v14 = vld [vmem:[#allocation2 + $0x10] sm:$0xff]  ;;  %vm259_vm0 = vmmov 0   ;;  %v28_v19 = vand.u32 127, %v27_v18  ;;  %vm69_vm5 = vcmask 523264  }
  0x11   :  { %174 = vmatpush3.msra.mxu0 %v68_v4  ;;  %31 = vperm.xlu0 %202, %v29_v6   ;;  %v45_v8 = vadd.s32 2, %v29_v6  ;;  %v37_v9 = vadd.s32 1, %v29_v6  ;;  %v53_v11 = vadd.s32 3, %v29_v6  ;;  %v62_v16 = vld [vmem:[#allocation2 + $0x8] sm:$0xff]  ;;  %v61_v17 = vld [vmem:[#allocation2] sm:$0xff]  ;;  %s260_s0 = smov [#allocation5]  }
  0x12   :  { %175 = vmatprep.subr.mxu0 %v256_v2  ;;  %189 = vmatprep.mubr.msk.f32.mxu0 %vm259_vm0, %v256_v2  ;;  %s150_s1 = sshll.u32 %s260_s0, 4  ;;  %s151_s1 = int_to_ptr.vmem [resolvable:$true] %s150_s1 }
  0x13   :  { %176 = vmatpush3.msra.mxu0 %v67_v5  ;;  %47 = vperm.xlu1 %204, %v45_v8   ;;  %s227_s18 = scalar_lea.vmem %s151_s1, 128  ;;  %p232_p6 = scmp.lt.s32.totalorder %s151_s1, %s151_s1 }
  0x14   :  { %177 = vmatprep.subr.mxu0 %v256_v2  ;;  %p228_p5 = scmp.ne.s32.totalorder %s151_s1, %s227_s18  ;;  %p233_p7 = scmp.lt.s32.totalorder %s227_s18, %s227_s18 }
  0x15   :  { %178 = vmatpush3.msra.mxu0 %v66_v7  ;;  %203 = vset.pattern.permute.xlu0 %v257_v13 }
  0x16   :  { %179 = vmatprep.subr.mxu0 %v256_v2  ;;  %39 = vperm.xlu0 %203, %v37_v9   ;;  %p234_p8 = por %p233_p7, %p232_p6 }
  0x17   :  { %180 = vmatpush3.msra.mxu0 %v65_v10  ;;  %205 = vset.pattern.permute.xlu1 %v258_v15 }
  0x18   :  { %181 = vmatprep.subr.mxu0 %v256_v2  ;;  %55 = vperm.xlu1 %205, %v53_v11   ;;  %p235_p9 = pnand %p234_p8, %p228_p5 }
  0x19   :  { %182 = vmatpush3.msra.mxu0 %v64_v12 }
  0x1a   :  { %183 = vmatprep.subr.mxu0 %v256_v2  ;;  %206 = vset.pattern.permute.xlu0 %v258_v15 }
  0x1b   :  { %184 = vmatpush3.msra.mxu0 %v63_v14 }
  0x1c   :  { %185 = vmatprep.subr.mxu0 %v256_v2 }
  0x1d   :  { %186 = vmatpush3.msra.mxu0 %v62_v16 }
  0x1e   :  { %187 = vmatprep.subr.mxu0 %v256_v2 }
  0x1f   :  { %188 = vmatpush3.msra.mxu0 %v61_v17 }
  0x8c   :  { %v32_v20 = vpop.permute.xlu0 %31 }
  0x8d   :  { %vm33_vm1 = vcmp.eq.s32.totalorder %v28_v19, %v32_v20 }
  0x8e   :  { %v48_v21 = vpop.permute.xlu1 %47  ;;  %v159_v23 = vsel %vm33_vm1, 1.0, %v256_v2 }
  0x8f   :  { %vm49_vm2 = vcmp.eq.s32.totalorder %v28_v19, %v48_v21 }
  0x90   :  { %v161_v27 = vsel %vm49_vm2, 1.0, %v256_v2 }
  0x91   :  { %v40_v22 = vpop.permute.xlu0 %39 }
  0x92   :  { %vm41_vm3 = vcmp.eq.s32.totalorder %v28_v19, %v40_v22 }
  0x93   :  { %v160_v24 = vsel %vm41_vm3, 1.0, %v256_v2  ;;  %v56_v25 = vpop.permute.xlu1 %55 }
  0x94   :  { %v44_v26 = vadd.f32 %v160_v24, %v159_v23  ;;  %vm57_vm4 = vcmp.eq.s32.totalorder %v28_v19, %v56_v25 }
  0x95   :  { %v162_v28 = vsel %vm57_vm4, 1.0, %v256_v2 }
  0x96   :  { %v52_v29 = vadd.f32 %v161_v27, %v44_v26 }
  0x98   :  { %v60_v30 = vadd.f32 %v162_v28, %v52_v29 }
  0x9a   :  { %190 = vmatmul.mubr.msk.f32.vlgmr.msra.gmra.mxu0 %vm69_vm5, %v60_v30 }
 0x15a   :  { %v139_v31 = vpop.f32.mrf.mxu0 }
 0x15b   :  { %143 = vst [vmem:[#allocation5] sm:$0xff] %v139_v31 }
 0x15c   :  { %v191_v32 = vpop.f32.mrf.mxu0 }
 0x15d   :  { %238 = shalt.err (!%p235_p9)
}
 0x15e   :  { %153 = dma.vmem_to_hbm [thread:$0]  %s151_s1, 128, %s287_s2, [#allocation4]  }
 0x15f   :  { %249 = dma.done.wait [#allocation4], 128  }
 0x160   :  { %250 = vsyncadd [#allocation4], 4294967168 }
 0x161   :  { %157 = vsyncpa [#allocation3], 1 }
 0x162   :  { %158 = vsyncpa [#allocation4], 1 }

</bundles_post_ra>
